<compile_context>
chip_gen: v5e
topology: v5e:2x2
jax: 0.10.0
libtpu: 0.0.40
codegen_flags: <defaults>
</compile_context>

<pallas_src>
import jax
import jax.numpy as jnp
from jax import lax
from jax.experimental import pallas as pl
from jax.experimental.pallas import tpu as pltpu


def _round_up(x, m):
    return (x + m - 1) // m * m


def _slab_gather_kernel(bs_ref, rel_ref, emb_lo_ref, emb_hi_ref, out_ref):
    """One-hot gather of tS rows out of two consecutive tS-row table slabs.

    bs_ref:     SMEM (B*n_tiles,) int32  -- scalar-prefetch; only index_maps use it
    rel_ref:    (tS, 1)  int32           -- position relative to the lo slab start
    emb_lo_ref: (tS, Dp) f32/bf16        -- table rows [bs*tS,      bs*tS +   tS)
    emb_hi_ref: (tS, Dp) f32/bf16        -- table rows [bs*tS + tS, bs*tS + 2*tS)
    out_ref:    (tS, Dp) f32
    """
    del bs_ref
    tS = out_ref.shape[0]
    rel = rel_ref[...]                                         # (tS, 1), in [0, 2*tS)
    k = lax.broadcasted_iota(jnp.int32, (tS, tS), 1)           # (tS, tS)
    onehot_lo = (rel == k).astype(emb_lo_ref.dtype)            # exact 0/1
    onehot_hi = (rel == k + tS).astype(emb_hi_ref.dtype)       # exact 0/1
    out = jnp.dot(onehot_lo, emb_lo_ref[...],
                  preferred_element_type=jnp.float32)
    out = out + jnp.dot(onehot_hi, emb_hi_ref[...],
                        preferred_element_type=jnp.float32)
    out_ref[...] = out.astype(out_ref.dtype)


def monotonic_position_encoding_by_mask(key_padding_mask, embedding, *,
                                        use_bf16_mxu=True, tokens_per_tile=256):
    """key_padding_mask: bool [B, S]; embedding: f32 [num_positions, emb_dim]."""
    B, S = key_padding_mask.shape
    P, D = embedding.shape
    out_dtype = embedding.dtype

    # ---- tiling ----
    tS = min(_round_up(S, 8), _round_up(max(tokens_per_tile, 8), 8))
    if B == 1 and _round_up(S, tS) // tS < 2 and S > 8:
        # Ensure >= 2 grid steps so both v7x TensorCores get work.
        tS = max(8, _round_up((S + 1) // 2, 8))
    S_pad = _round_up(S, tS)
    n_tiles = S_pad // tS
    Dp = _round_up(D, 128)                           # lane-dense, unmasked stores

    # ---- wrapper-side glue: O(B*S) int ops on the positions ----
    inv = jnp.logical_not(key_padding_mask).astype(jnp.int32)
    pos = jnp.cumsum(inv, axis=-1)                   # [B, S], values in [0, S]
    if S_pad != S:
        pos = jnp.pad(pos, ((0, 0), (0, S_pad - S)), mode="edge")

    # Positions of tile t of row b lie in [pos[b, t*tS], pos[b, t*tS] + tS - 1],
    # i.e. fully inside table blocks {bs, bs+1} with bs = pos[b, t*tS] // tS.
    tile_first = pos[:, ::tS]                                    # (B, n_tiles)
    block_starts = (tile_first // tS).astype(jnp.int32)          # (B, n_tiles)
    rel = (pos - jnp.repeat(block_starts * tS, tS, axis=1)).astype(jnp.int32)
    rel_flat = rel.reshape(B * S_pad, 1)
    block_starts_flat = block_starts.reshape(-1)                 # SMEM prefetch

    # ---- table: only rows 0..S are reachable; pad rows to whole tS blocks ----
    P_eff = min(P, S + 1)
    n_blocks = S // tS + 2                    # max block index used is S//tS + 1
    P_pad = n_blocks * tS
    emb = embedding[:P_eff]
    emb = jnp.pad(emb, ((0, P_pad - P_eff), (0, Dp - D)))
    if use_bf16_mxu:
        # 0/1 one-hot is exact in bf16; only the table cast loses precision
        # (~1e-2 rel).  Use use_bf16_mxu=False for exact f32 parity.
        emb = emb.astype(jnp.bfloat16)
    emb_item = jnp.dtype(emb.dtype).itemsize
    out_item = jnp.dtype(out_dtype).itemsize

    grid = (B, n_tiles)

    # ---- VMEM budget & cost estimate ----
    per_step = (tS * 4                       # rel block
                + 2 * tS * Dp * emb_item     # lo + hi table slabs
                + tS * Dp * out_item)        # output block
    need = 2 * per_step + 2 * tS * tS * emb_item + tS * Dp * 4
    try:
        cap = int(getattr(pltpu.get_tpu_info(), "vmem_capacity_bytes",
                          64 * 1024 * 1024))
    except Exception:  # conservative fallback if hw query is unavailable
        cap = 64 * 1024 * 1024
    vmem_limit = int(min(int(0.9 * cap), max(4 * need, 16 * 1024 * 1024)))

    cost = pl.CostEstimate(
        flops=2 * (B * S_pad) * (2 * tS) * Dp,
        transcendentals=0,
        bytes_accessed=(B * n_tiles * 2 * tS * Dp * emb_item   # slab fetches
                        + B * S_pad * 4                        # rel positions
                        + B * S_pad * Dp * out_item),          # output
    )

    out_flat = pl.pallas_call(
        _slab_gather_kernel,
        out_shape=jax.ShapeDtypeStruct((B * S_pad, Dp), out_dtype),
        grid_spec=pltpu.PrefetchScalarGridSpec(
            num_scalar_prefetch=1,
            grid=grid,
            in_specs=[
                # Relative positions for this tile (tiny: 4*tS bytes).
                pl.BlockSpec((tS, 1), lambda b, t, bs: (b * n_tiles + t, 0)),
                # lo / hi table slabs: data-dependent block index from SMEM.
                pl.BlockSpec((tS, Dp),
                             lambda b, t, bs: (bs[b * n_tiles + t], 0)),
                pl.BlockSpec((tS, Dp),
                             lambda b, t, bs: (bs[b * n_tiles + t] + 1, 0)),
            ],
            out_specs=pl.BlockSpec((tS, Dp),
                                   lambda b, t, bs: (b * n_tiles + t, 0)),
        ),
        compiler_params=pltpu.CompilerParams(
            dimension_semantics=("parallel", "parallel"),
            vmem_limit_bytes=vmem_limit),
        cost_estimate=cost,
    )(block_starts_flat, rel_flat, emb, emb)

    return out_flat[:, :D].reshape(B, S_pad, D)[:, :S, :]


if __name__ == "__main__":
    B, S = 2, 8
    num_positions = 16          # must be >= S + 1 (cumsum can reach S)
    emb_dim = 32

    key = jax.random.PRNGKey(0)
    # Deterministic "parameters": embedding table ~ N(0, 1), like nn.Embedding init.
    embedding = jax.random.normal(key, (num_positions, emb_dim), dtype=jnp.float32)

    # Deterministic key_padding_mask: True where position >= length (padding).
    lengths = jnp.array([5, 3], dtype=jnp.int32)
    positions = jnp.arange(S, dtype=jnp.int32)[None, :]
    key_padding_mask = positions >= lengths[:, None]              # bool [B, S]

    # Default fast path: bf16 MXU inputs (exact one-hot, table rounded to bf16).
    out_bf16 = monotonic_position_encoding_by_mask(key_padding_mask, embedding)
    # Exact-parity path.
    out_f32 = monotonic_position_encoding_by_mask(key_padding_mask, embedding,
                                                  use_bf16_mxu=False)
    out_bf16, out_f32 = jax.block_until_ready((out_bf16, out_f32))

    # Pure-JAX references.
    inv = jnp.logical_not(key_padding_mask).astype(jnp.int32)
    pos_ref = jnp.cumsum(inv, axis=-1)
    ref = embedding[pos_ref]
    ref_bf16 = embedding.astype(jnp.bfloat16).astype(jnp.float32)[pos_ref]

    assert out_f32.shape == (B, S, emb_dim)
    assert out_bf16.shape == (B, S, emb_dim)
    assert jnp.allclose(out_f32, ref, atol=1e-5), "f32 path mismatch vs reference"
    assert jnp.allclose(out_bf16, ref_bf16, atol=1e-6), \
        "bf16 path mismatch vs bf16-rounded reference"
    assert jnp.allclose(out_bf16, ref, atol=5e-2, rtol=5e-2), \
        "bf16 path too far from f32 reference"

    print("KERNEL_OK")
</pallas_src>

<mosaic_0001>
module attributes {stable_mosaic.version = 11 : i64} {
  func.func @_slab_gather_kernel(%arg0: i32, %arg1: i32, %arg2: memref<2xi32, #tpu.memory_space<smem>>, %arg3: memref<8x1xi32, #tpu.memory_space<vmem>>, %arg4: memref<8x128xbf16, #tpu.memory_space<vmem>>, %arg5: memref<8x128xbf16, #tpu.memory_space<vmem>>, %arg6: memref<8x128xf32, #tpu.memory_space<vmem>>) attributes {dimension_semantics = [#tpu.dimension_semantics<parallel>, #tpu.dimension_semantics<parallel>], iteration_bounds = array<i64: 2, 1>, scalar_prefetch = 1 : i64, scratch_operands = 0 : i64, tpu.core_type = #tpu.core_type<tc>, window_params = [{transform_indices = @transform_0, window_bounds = array<i64: 8, 1>}, {transform_indices = @transform_1, window_bounds = array<i64: 8, 128>}, {transform_indices = @transform_2, window_bounds = array<i64: 8, 128>}, {transform_indices = @transform_3, window_bounds = array<i64: 8, 128>}]} {
    %c0 = arith.constant 0 : index
    %c0_0 = arith.constant 0 : index
    %0 = vector.load %arg3[%c0, %c0_0] : memref<8x1xi32, #tpu.memory_space<vmem>>, vector<8x1xi32>
    %1 = tpu.iota {dimensions = array<i32: 1>} : vector<8x8xi32>
    %2 = vector.broadcast %0 : vector<8x1xi32> to vector<8x8xi32>
    %3 = arith.cmpi eq, %2, %1 : vector<8x8xi32>
    %4 = arith.extui %3 : vector<8x8xi1> to vector<8x8xi32>
    %5 = arith.sitofp %4 : vector<8x8xi32> to vector<8x8xf32>
    %6 = arith.truncf %5 : vector<8x8xf32> to vector<8x8xbf16>
    %c8_i32 = arith.constant 8 : i32
    %7 = vector.broadcast %c8_i32 : i32 to vector<8x8xi32>
    %8 = arith.addi %1, %7 : vector<8x8xi32>
    %9 = vector.broadcast %0 : vector<8x1xi32> to vector<8x8xi32>
    %10 = arith.cmpi eq, %9, %8 : vector<8x8xi32>
    %11 = arith.extui %10 : vector<8x8xi1> to vector<8x8xi32>
    %12 = arith.sitofp %11 : vector<8x8xi32> to vector<8x8xf32>
    %13 = arith.truncf %12 : vector<8x8xf32> to vector<8x8xbf16>
    %c0_1 = arith.constant 0 : index
    %c0_2 = arith.constant 0 : index
    %14 = vector.load %arg4[%c0_1, %c0_2] : memref<8x128xbf16, #tpu.memory_space<vmem>>, vector<8x128xbf16>
    %cst = arith.constant dense<0.000000e+00> : vector<8x128xf32>
    %15 = tpu.matmul %6, %14, %cst {dimension_numbers = #tpu.dot_dimension_numbers<[1], [0], [0], [1], [0, 0, 1, 1], [], []>} : vector<8x8xbf16>, vector<8x128xbf16>, vector<8x128xf32> -> vector<8x128xf32>
    %c0_3 = arith.constant 0 : index
    %c0_4 = arith.constant 0 : index
    %16 = vector.load %arg5[%c0_3, %c0_4] : memref<8x128xbf16, #tpu.memory_space<vmem>>, vector<8x128xbf16>
    %cst_5 = arith.constant dense<0.000000e+00> : vector<8x128xf32>
    %17 = tpu.matmul %13, %16, %cst_5 {dimension_numbers = #tpu.dot_dimension_numbers<[1], [0], [0], [1], [0, 0, 1, 1], [], []>} : vector<8x8xbf16>, vector<8x128xbf16>, vector<8x128xf32> -> vector<8x128xf32>
    %18 = arith.addf %15, %17 : vector<8x128xf32>
    %c0_6 = arith.constant 0 : index
    %c0_7 = arith.constant 0 : index
    %19 = vector.load %arg6[%c0_6, %c0_7] : memref<8x128xf32, #tpu.memory_space<vmem>>, vector<8x128xf32>
    tpu.vector_store %arg6[%c0_6, %c0_7], %18 {strides = array<i32>} : memref<8x128xf32, #tpu.memory_space<vmem>>, vector<8x128xf32>,
    return
  }
  func.func @transform_0(%arg0: i32, %arg1: i32, %arg2: memref<2xi32, #tpu.memory_space<smem>>) -> (i32, i32) {
    %c1_i32 = arith.constant 1 : i32
    %0 = arith.muli %arg0, %c1_i32 : i32
    %1 = arith.addi %0, %arg1 : i32
    %c0_i32 = arith.constant 0 : i32
    %c0_i32_0 = arith.constant 0 : i32
    return %1, %c0_i32 : i32, i32
  }
  func.func @transform_1(%arg0: i32, %arg1: i32, %arg2: memref<2xi32, #tpu.memory_space<smem>>) -> (i32, i32) {
    %c1_i32 = arith.constant 1 : i32
    %0 = arith.muli %arg0, %c1_i32 : i32
    %1 = arith.addi %0, %arg1 : i32
    %2 = arith.index_cast %1 : i32 to index
    %3 = memref.load %arg2[%2] : memref<2xi32, #tpu.memory_space<smem>>
    %c0_i32 = arith.constant 0 : i32
    %c0_i32_0 = arith.constant 0 : i32
    return %3, %c0_i32 : i32, i32
  }
  func.func @transform_2(%arg0: i32, %arg1: i32, %arg2: memref<2xi32, #tpu.memory_space<smem>>) -> (i32, i32) {
    %c1_i32 = arith.constant 1 : i32
    %0 = arith.muli %arg0, %c1_i32 : i32
    %1 = arith.addi %0, %arg1 : i32
    %2 = arith.index_cast %1 : i32 to index
    %3 = memref.load %arg2[%2] : memref<2xi32, #tpu.memory_space<smem>>
    %c1_i32_0 = arith.constant 1 : i32
    %4 = arith.addi %3, %c1_i32_0 : i32
    %c0_i32 = arith.constant 0 : i32
    %c0_i32_1 = arith.constant 0 : i32
    return %4, %c0_i32 : i32, i32
  }
  func.func @transform_3(%arg0: i32, %arg1: i32, %arg2: memref<2xi32, #tpu.memory_space<smem>>) -> (i32, i32) {
    %c1_i32 = arith.constant 1 : i32
    %0 = arith.muli %arg0, %c1_i32 : i32
    %1 = arith.addi %0, %arg1 : i32
    %c0_i32 = arith.constant 0 : i32
    %c0_i32_0 = arith.constant 0 : i32
    return %1, %c0_i32 : i32, i32
  }
}

</mosaic_0001>

<bundles_post_ra>
// kernel: tpu_custom_call.1
= control target key start
LH: loop header
LB: loop body
LE: loop exit
PB: predicated region body
PF: predicated region fallthrough
CT: control target
= control target key end

     0   :  { %s724_s18 = smov [#allocation3]   ;;  %s935_s0 = inlined_call_operand.vmem [shape: s32[2], index: 0, kind: input, shape index: {}]   ;;  %s936_s1 = inlined_call_operand.vmem [shape: s32[16,1], index: 1, kind: input, shape index: {}]   ;;  %s937_s2 = inlined_call_operand.vmem [shape: bf16[24,128], index: 2, kind: input, shape index: {}]   ;;  %s938_s3 = inlined_call_operand.hbm [shape: bf16[24,128], index: 3, kind: input, shape index: {}]   ;;  %s939_s4 = inlined_call_operand.hbm [shape: f32[16,128], index: 4, kind: output, shape index: {}]  }
   0x1   :  { %s10_s17 = sshll.u32 %s935_s0, 4  ;;  %s11_s17 = int_to_ptr.vmem [resolvable:$true] %s10_s17 }
   0x2   :  { %13 = dma.vmem_to_smem %s11_s17, 16, %s724_s18, [#allocation2] }
   0x3   :  { %678 = dma.done.wait [#allocation2], 16 }
   0x4   :  { %679 = vsyncadd [#allocation2], 4294967280 }
   0x5   :  { %16 = sfence }
   0x6   :  { %17 = vsyncpa [#allocation5], 0 }
   0x7   :  { %19 = vsyncpa [#allocation5 + $0x1], 0 }
   0x8   :  { %20 = vsyncpa [#allocation6], 0 }
   0x9   :  { %22 = vsyncpa [#allocation6 + $0x1], 0  ;;  %s755_s19 = smov 0   ;;  %s757_s20 = smov 0  }
   0xa   :  { %s759_s21 = smov 0   ;;  %s761_s22 = smov 0  }
   0xb   :  { %s763_s23 = smov 0   ;;  %s765_s0 = smov 0  }
   0xc   :  { %s767_s24 = smov 0   ;;  %s769_s25 = smov 0  }
   0xd   :  { %s771_s26 = smov 0  }
   0xe LB: > { %943 = sst [smem:[#allocation13_spill]] %s710_s0  ;;  %s459_s27 = sadd.s32 4294967295, %s722_s26   ;;  %s722_s26 = sphi %s771_s26, %s28_s26   ;;  %s718_s25 = sphi %s769_s25, %s956_s25   ;;  %s714_s24 = sphi %s767_s24, %s955_s24   ;;  %s710_s0 = sphi %s765_s0, %s954_s0   ;;  %s706_s23 = sphi %s763_s23, %s961_s23   ;;  %s702_s22 = sphi %s761_s22, %s960_s22   ;;  %s698_s21 = sphi %s759_s21, %s959_s21   ;;  %s694_s20 = sphi %s757_s20, %s958_s20   ;;  %s690_s19 = sphi %s755_s19, %s957_s19  }
   0xf   : > { %944 = sst [smem:[#allocation14_spill]] %s718_s25  ;;  %s460_s28 = sadd.s32 4294967294, %s722_s26  }
  0x10   : > { %s40_s29 = sadd.s32 1, %s718_s25  ;;  %s103_s30 = sld [smem:[#allocation3 + %s718_s25]] }
  0x11   : > { %p42_p0 = scmp.ge.s32.totalorder %s40_s29, 2  ;;  %s111_s5 = sadd.s32 1, %s710_s0 }
  0x12   : > { %p118_p1 = scmp.ne.s32.totalorder %s710_s0, %s706_s23  ;;  %p119_p2 = scmp.eq.s32.totalorder %s722_s26, 0 }
  0x13   : > { %s963_s29 = smov (%p42_p0, %s40_s29), 0  ;;  %p124_p4 = scmp.ne.s32.totalorder %s706_s23, %s702_s22 }
  0x14   : > { %945 = sst [smem:[#allocation15_spill]] %s963_s29  ;;  %p808_p3 = por %p119_p2, %p118_p1 }
  0x15   : > { %s106_s7 = sld [smem:[#allocation3 + %s963_s29]]  ;;  %p125_p5 = scmp.eq.s32.totalorder %s459_s27, 0 }
  0x16   : > { %s104_s8 = sadd.s32 1, %s103_s30  ;;  %s136_s9 = ssub.s32 %s718_s25, %s963_s29 }
  0x17   : > { %p816_p6 = por %p125_p5, %p124_p4  ;;  %p137_p7 = scmp.eq.s32.totalorder %s136_s9, 0 }
  0x18   : > { %s139_s11 = sadd.s32 1, %s698_s21  ;;  %p149_p8 = scmp.ne.s32.totalorder %s698_s21, %s694_s20 }
  0x19   : > { %s824_s12 = scalar_select %p137_p7, %s698_s21, %s139_s11  }
  0x1a   : > { %p150_p9 = scmp.eq.s32.totalorder %s459_s27, 1  ;;  %p155_p10 = scmp.ne.s32.totalorder %s694_s20, %s690_s19 }
  0x1b   : > { %s107_s13 = sadd.s32 1, %s106_s7  ;;  %p156_p11 = scmp.eq.s32.totalorder %s460_s28, 1 }
  0x1c   : > { %s108_s14 = ssub.s32 %s104_s8, %s107_s13  ;;  %p828_p12 = por %p150_p9, %p149_p8 }
  0x1d   : > { %p109_p13 = scmp.eq.s32.totalorder %s108_s14, 0  ;;  %p832_p0 = por %p156_p11, %p155_p10 }
  0x1e   : > { %p462_p1 = scmp.ge.s32.totalorder %s722_s26, 2  ;;  %p494_p2 = scmp.lt.s32.totalorder %s722_s26, 2 }
  0x1f   : > { %s839_s17 = scalar_select %p109_p13, %s710_s0, %s111_s5  }
  0x20   : > { %p843_p4 = pnand %p494_p2, %p808_p3  ;;  %s196_s22 = sand.u32 1, %s710_s0  }
  0x21   : > { %950 = sst [smem:[#allocation16_spill]] %s839_s17  ;;  %s463_s30 = sshll.u32 %s196_s22, 2 }
  0x22   : > { %s478_s27 = scalar_select %p808_p3, [#allocation3], [#allocation8] }
  0x23   : > { %s479_s28 = scalar_select %p808_p3, %s718_s25, 0 }
  0x24   : > { %s965_s27 = smov (!%p494_p2, %s478_s27), [#allocation9]  ;;  %p465_p5 = scmp.ge.s32.totalorder %s722_s26, 1 }
  0x25   : > { %s967_s28 = smov (!%p494_p2, %s479_s28), 0  ;;  %p216_p7 = scmp.lt.s32.totalorder %s722_s26, 3 }
  0x26   : > { %s202_s7 = sld [smem:[%s965_s27 + %s967_s28]]  ;;  %s200_s8 = scalar_lea.vmem [#allocation4], %s463_s30 }
  0x27   : > { %p855_p8 = pnand %p465_p5, %p216_p7  ;;  %s211_s9 = sshll.u32 %s200_s8, 4  ;;  %s212_s9 = int_to_ptr.vmem [resolvable:$true] %s211_s9 }
  0x28   : > { %s197_s17 = scalar_lea.sflag [#allocation5], %s196_s22  ;;  %p588_p9 = pneg %p843_p4 }
  0x2c   : > { %s464_s11 = sshll.u32 %s202_s7, 2  ;;  %s591_s7 = scalar_lea.hbm %s938_s3, 12 }
  0x2d   : > { %s387_s29 = scalar_lea.hbm %s938_s3, %s464_s11 }
  0x2e   : > { %s388_s6 = scalar_lea.hbm %s387_s29, 4 }
  0x2f   : > { %s209_s25 = sshll.u32 %s388_s6, 4  ;;  %s210_s25 = int_to_ptr.hbm [resolvable:$true] %s209_s25 }
  0x30   : > { %s584_s0 = sshra.s32 %s210_s25, 4  ;;  %s585_s0 = int_to_ptr.hbm [resolvable:$true] %s584_s0 }
  0x31   : > { %s586_s27 = scalar_lea.hbm %s585_s0, 4  ;;  %p592_p13 = scmp.lt.s32.totalorder %s585_s0, %s938_s3 }
  0x32   : > { %p587_p3 = scmp.ne.s32.totalorder %s585_s0, %s586_s27  ;;  %p593_p2 = scmp.lt.s32.totalorder %s591_s7, %s586_s27 }
  0x34   : > { %p589_p10 = pnand %p588_p9, %p587_p3  ;;  %p594_p5 = por %p593_p2, %p592_p13 }
  0x36   : > { %p590_p11 = pneg %p589_p10 }
  0x38   : > { %p595_p7 = pnand %p594_p5, %p590_p11 }
  0x3a   : > { %598 = shalt.err (!%p595_p7)
}
  0x3b   : > { %489 = dma.hbm_to_vmem [thread:$0]  (!%p843_p4), %s210_s25, 64, %s212_s9, %s197_s17  }
  0x3c   : > { %220 = sbr.rel (%p855_p8) target bundleno = 326 (0x146), region = 32  ;;  %s222_s29 = sand.u32 (!%p855_p8), 1, %s706_s23  }
  0x3d   : > { %s466_s22 = sshll.u32 (!%p855_p8), %s222_s29, 2  ;;  %s223_s11 = scalar_lea.sflag (!%p855_p8), [#allocation5], %s222_s29 }
  0x3e   : > { %s226_s14 = scalar_lea.vmem (!%p855_p8), [#allocation4], %s466_s22 }
  0x41   : > { %681 = dma.done.wait (%p816_p6), %s223_s11, 64  }
  0x42   : > { %683 = vsyncadd (%p816_p6), %s223_s11, 4294967232  ;;  %p262_p3 = scmp.lt.s32.totalorder %s714_s24, 1  ;;  %v725_v0 = vmov 0   ;;  %s268_s9 = sld [smem:[#allocation3 + %s714_s24]]  ;;  %v296_v2 = vld [vmem:[%s226_s14] sm:$0xf]  ;;  %v281_v6 = vlaneseq }
  0x43   : > { %571 = vset.pattern.permute.xlu0 %v725_v0  ;;  %vm301_vm0 = vcmask 1043456   ;;  %v726_v10 = vmov 0.0   ;;  %vm297_vm3 = vcmask 64512   ;;  %s258_s30 = sand.u32 1, %s694_s20   ;;  %s475_s7 = sshll.u32 %s714_s24, 3 }
  0x44   : > { %s263_s0 = scalar_select %p262_p3, %s714_s24, 1  ;;  %v303_v4 = vsel %vm301_vm0, %v296_v2, 0  ;;  %v282_v7 = vand.u32 127, %v281_v6 }
  0x45   : > { %312 = vmatpush.bf16.msra.mxu0 %v303_v4  ;;  %s467_s8 = sshll.u32 %s258_s30, 3  ;;  %s350_s22 = scalar_lea.hbm %s939_s4, %s475_s7 }
  0x46   : > { %s468_s25 = sshll.u32 %s263_s0, 3  ;;  %v290_v8 = vadd.s32 8, %v282_v7  ;;  %s260_s11 = scalar_lea.vmem [#allocation7], %s467_s8 }
  0x47   : > { %s265_s5 = scalar_lea.vmem %s936_s1, %s468_s25  ;;  %s352_s14 = sshll.u32 %s260_s11, 4  ;;  %s353_s14 = int_to_ptr.vmem [resolvable:$true] %s352_s14 }
  0x48   : > { %v280_v1 = vld [vmem:[%s265_s5] sm:$0xff]  ;;  %p269_p4 = scmp.lt.s32.totalorder %s268_s9, 2  ;;  %s354_s0 = sshll.u32 %s350_s22, 4  ;;  %s355_s0 = int_to_ptr.hbm [resolvable:$true] %s354_s0 }
  0x49   : > { %284 = vperm.xlu0 %571, %v280_v1   ;;  %s339_s25 = scalar_lea.sflag [#allocation6], %s258_s30  ;;  %s628_s17 = sshra.s32 %s355_s0, 4  ;;  %s629_s17 = int_to_ptr.hbm [resolvable:$true] %s628_s17 }
  0x4a   : > { %s969_s9 = smov (!%p269_p4, %s268_s9), 2  ;;  %s630_s18 = scalar_lea.hbm %s629_s17, 8 }
  0x4b   : > { %s469_s6 = sshll.u32 %s969_s9, 2  ;;  %p631_p6 = scmp.ne.s32.totalorder %s629_s17, %s630_s18 }
  0x4c   : > { %s272_s28 = scalar_lea.vmem %s937_s2, %s469_s6  ;;  %s634_s9 = scalar_lea.hbm %s939_s4, 16 }
  0x4d   : > { %v295_v3 = vld [vmem:[%s272_s28] sm:$0xf]  ;;  %p632_p8 = pnand %p631_p6, %p828_p12  ;;  %p635_p10 = scmp.lt.s32.totalorder %s629_s17, %s939_s4 }
  0x4e   : > { %v322_v5 = vsel %vm301_vm0, %v295_v3, 0  ;;  %p636_p11 = scmp.lt.s32.totalorder %s634_s9, %s630_s18 }
  0x4f   : > { %331 = vmatpush.bf16.msra.mxu1 %v322_v5  ;;  %p633_p9 = pneg %p632_p8 }
  0x50   : > { %p637_p13 = por %p636_p11, %p635_p10 }
  0x52   : > { %p638_p2 = pnand %p637_p13, %p633_p9 }
  0xbb   : > { %v285_v9 = vpop.permute.xlu0 %284 }
  0xbc   : > { %vm286_vm1 = vcmp.eq.s32.totalorder %v285_v9, %v282_v7  ;;  %vm291_vm2 = vcmp.eq.s32.totalorder %v285_v9, %v290_v8 }
  0xbd   : > { %v470_v11 = vsel %vm286_vm1, 1.0, %v726_v10  ;;  %v471_v12 = vsel %vm291_vm2, 1.0, %v726_v10 }
  0xbe   : > { %v289_v13 = vpack.c.bf16 %v470_v11, %v470_v11  ;;  %v294_v14 = vpack.c.bf16 %v471_v12, %v471_v12 }
  0xc0   : > { %472 = vmatmul.msk.bf16.vlgmr.msra.gmra.mxu0 %vm297_vm3, %v294_v14  ;;  %473 = vmatmul.msk.bf16.vlgmr.msra.gmra.mxu1 %vm297_vm3, %v289_v13 }
 0x13d   : > { %v314_v15 = vpop.f32.mrf.mxu0  ;;  %v333_v16 = vpop.f32.mrf.mxu1 }
 0x13e   : > { %v334_v17 = vadd.f32 %v333_v16, %v314_v15 }
 0x140   : > { %337 = vst [vmem:[%s260_s11] sm:$0xff] %v334_v17 }
 0x141   : > { %641 = shalt.err (!%p638_p2)
}
 0x142   : > { %482 = dma.vmem_to_hbm [thread:$0]  (%p828_p12), %s353_s14, 128, %s355_s0, %s339_s25  }
 0x145   : > { %v316_v18 = vpop.f32.mrf.mxu0  ;;  %v335_v19 = vpop.f32.mrf.mxu1 }
 0x146 PF: > { %s366_s27 = sand.u32 1, %s690_s19   ;;  %p491_p5 = pnand %p462_p1, %p832_p0 }
 0x147   : > { %s367_s28 = scalar_lea.sflag [#allocation6], %s366_s27 }
 0x148   : > { %p492_p7 = pneg %p491_p5 }
 0x14a   : > { %685 = dma.done.wait (%p492_p7), %s367_s28, 128  }
 0x14b   : > { %687 = vsyncadd (%p492_p7), %s367_s28, 4294967168  ;;  %s28_s26 = sadd.s32 1, %s722_s26   ;;  %s953_s15 = sld [smem:[#allocation13_spill]] }
 0x14c   : > { %p25_p3 = scmp.ge.s32.totalorder %s28_s26, 4   ;;  %s954_s0 = sld [smem:[#allocation16_spill]] }
 0x14d   : > { %s955_s24 = sld [smem:[#allocation14_spill]]  ;;  %s957_s19 = smov %s694_s20 }
 0x14e   : > { %s956_s25 = sld [smem:[#allocation15_spill]]  ;;  %s958_s20 = smov %s698_s21 }
 0x14f   : > { %s959_s21 = smov %s824_s12  ;;  %s960_s22 = smov %s706_s23 }
 0x150   :  { %27 = sbr.rel (!%p25_p3) target bundleno = 14 (0xe), region = 83 }
 0x151   : > { %s961_s23 = smov %s953_s15 }
 0x155   :  { %373 = vsyncpa [#allocation5], 1 }
 0x156   :  { %375 = vsyncpa [#allocation5 + $0x1], 1 }
 0x157   :  { %376 = vsyncpa [#allocation6], 1 }
 0x158   :  { %378 = vsyncpa [#allocation6 + $0x1], 1 }

</bundles_post_ra>
